<compile_context>
chip_gen: v6e
topology: v6e:2x2x1
jax: 0.10.0
libtpu: 0.0.40
codegen_flags: <defaults>
</compile_context>

<pallas_src>
import functools
import math

import jax
import jax.numpy as jnp
from jax.experimental import pallas as pl
from jax.experimental.pallas import tpu as pltpu


_LANE = 128
# Per-input-block VMEM budget. in + out blocks are both double-buffered
# (~4x this => ~24 MiB), safely under every generation's limits once we raise
# the scoped limit below (v7x physical VMEM is 64 MiB per TC).
_BLOCK_BYTES_BUDGET = 6 * 1024 * 1024
_VMEM_LIMIT_BYTES = 40 * 1024 * 1024


def _cdiv(a, b):
    return -(-a // b)


def _round_up(x, m):
    return _cdiv(x, m) * m


def _choose_tn(n, per_sample_bytes, budget):
    """Largest divisor of n that fits the VMEM budget and keeps >=2 grid steps."""
    tn_max = max(1, budget // per_sample_bytes)
    cap = 1 if n <= 1 else max(1, min(tn_max, _cdiv(n, 2)))   # >=2 steps for v7x megacore
    for tn in range(min(cap, n), 0, -1):
        if n % tn == 0:
            return tn
    return 1


# ---------------------------------------------------------------------------
# Fused kernel: avg-pool + both 1x1 convs + sigmoid + gate, all VMEM-resident.
# ---------------------------------------------------------------------------
def _ca_fused_kernel(x_ref, w1t_ref, b1_ref, w2_ref, b2_ref, o_ref, *, inv_hw):
    """x_ref/o_ref: (TN, C, HWp).  w1t/w2: (C, Cr).  b1: (1, Cr).  b2: (1, C)."""
    # Phase 1: global average pool (accumulate in f32; result is tiny (TN, C)).
    pooled = jnp.sum(x_ref[...].astype(jnp.float32), axis=2) * inv_hw        # (TN, C)

    # Tiny squeeze/excite MLP as broadcast-mul + reduce on the VPU/XLU
    # (C, Cr are far below MXU tile sizes, so MXU pushes would be wasted).
    y1 = jnp.sum(pooled[:, :, None] * w1t_ref[...][None, :, :], axis=1)      # (TN, Cr)
    y1 = jnp.maximum(y1 + b1_ref[...], 0.0)
    y2 = jnp.sum(y1[:, None, :] * w2_ref[...][None, :, :], axis=2)           # (TN, C)
    gate = jax.nn.sigmoid(y2 + b2_ref[...])                                  # (TN, C) f32

    # Phase 2: independent re-read of x; gate-multiply and store in the native
    # dtype (no full-tile f32 copy of x held live across both phases).
    o_ref[...] = x_ref[...] * gate.astype(o_ref.dtype)[:, :, None]


# ---------------------------------------------------------------------------
# Fallback gate-multiply kernel (two-pass path for slabs that exceed VMEM).
# ---------------------------------------------------------------------------
def _gate_mul_kernel(x_ref, gate_ref, o_ref):
    """x_ref/o_ref: (1, C, HWT).  gate_ref: (1, C, 1)."""
    o_ref[...] = x_ref[...] * gate_ref[...].astype(o_ref.dtype)


def _gate_from_pooled(pooled_f32, params):
    y = jnp.maximum(pooled_f32 @ params["w1t"] + params["b1"], 0.0)
    y = y @ params["w2"].T + params["b2"]
    return jax.nn.sigmoid(y)                                                 # (N, C) f32


# ---------------------------------------------------------------------------
# Wrapper (NCHW in / NCHW out, matching PyTorch)
# ---------------------------------------------------------------------------
def calayer_forward(x_nchw, params, *, force_two_pass=False):
    N, C, H, W = x_nchw.shape
    HW = H * W
    itemsize = jnp.dtype(x_nchw.dtype).itemsize
    w1t, b1, w2, b2 = params["w1t"], params["b1"], params["w2"], params["b2"]
    Cr = w1t.shape[1]

    hwp = _round_up(HW, _LANE)                      # lane-dense, unmasked stores
    per_sample_bytes = C * hwp * itemsize
    fused_ok = (per_sample_bytes <= _BLOCK_BYTES_BUDGET) and not force_two_pass

    x = x_nchw.reshape(N, C, HW)                    # contiguous reshape, free

    if fused_ok:
        if hwp != HW:
            x = jnp.pad(x, ((0, 0), (0, 0), (0, hwp - HW)))   # zeros: pool unaffected
        tn = _choose_tn(N, per_sample_bytes, _BLOCK_BYTES_BUDGET)
        n_blocks = N // tn
        out = pl.pallas_call(
            functools.partial(_ca_fused_kernel, inv_hw=1.0 / HW),
            out_shape=jax.ShapeDtypeStruct((N, C, hwp), x.dtype),
            grid=(n_blocks,),
            in_specs=[
                pl.BlockSpec((tn, C, hwp), lambda n: (n, 0, 0)),
                pl.BlockSpec((C, Cr), lambda n: (0, 0)),
                pl.BlockSpec((1, Cr), lambda n: (0, 0)),
                pl.BlockSpec((C, Cr), lambda n: (0, 0)),
                pl.BlockSpec((1, C), lambda n: (0, 0)),
            ],
            out_specs=pl.BlockSpec((tn, C, hwp), lambda n: (n, 0, 0)),
            compiler_params=pltpu.CompilerParams(
                dimension_semantics=("parallel",),
                vmem_limit_bytes=_VMEM_LIMIT_BYTES),
        )(x, w1t, b1, w2, b2)
        if hwp != HW:
            out = out[:, :, :HW]
        return out.reshape(N, C, H, W)

    # ---- Two-pass fallback: tiny pooled+MLP stage (plain JAX, f32) plus a
    # trivially HW-tiled Pallas gate-multiply.  Re-reads x (~1.5x traffic) but
    # has no per-image VMEM ceiling; used only when the fused block can't fit.
    pooled = jnp.mean(x, axis=2, dtype=jnp.float32)                 # (N, C)
    gate = _gate_from_pooled(pooled, params)[:, :, None]            # (N, C, 1) f32

    hwt_cap = max(_LANE, (_BLOCK_BYTES_BUDGET // (C * itemsize)) // _LANE * _LANE)
    n_tiles = _cdiv(_round_up(HW, _LANE), hwt_cap)
    hwt = _round_up(_cdiv(HW, n_tiles), _LANE)
    hwp2 = hwt * n_tiles
    if hwp2 != HW:
        x = jnp.pad(x, ((0, 0), (0, 0), (0, hwp2 - HW)))
    out = pl.pallas_call(
        _gate_mul_kernel,
        out_shape=jax.ShapeDtypeStruct((N, C, hwp2), x.dtype),
        grid=(N, n_tiles),
        in_specs=[
            pl.BlockSpec((1, C, hwt), lambda n, t: (n, 0, t)),
            pl.BlockSpec((1, C, 1), lambda n, t: (n, 0, 0)),
        ],
        out_specs=pl.BlockSpec((1, C, hwt), lambda n, t: (n, 0, t)),
        compiler_params=pltpu.CompilerParams(
            dimension_semantics=("parallel", "parallel"),
            vmem_limit_bytes=_VMEM_LIMIT_BYTES),
    )(x, gate)
    if hwp2 != HW:
        out = out[:, :, :HW]
    return out.reshape(N, C, H, W)


# ---------------------------------------------------------------------------
# Pure-JAX reference (same math as PyTorch CALayer.forward)
# ---------------------------------------------------------------------------
def calayer_ref(x_nchw, params):
    pooled = jnp.mean(x_nchw, axis=(2, 3))                          # (N, C)
    y = jnp.maximum(pooled @ params["w1t"] + params["b1"], 0.0)     # (N, Cr)
    y = y @ params["w2"].T + params["b2"]                           # (N, C)
    gate = jax.nn.sigmoid(y)
    return x_nchw * gate[:, :, None, None]


# ---------------------------------------------------------------------------
def init_calayer_params(key, channel, reduction):
    cr = max(channel // reduction, 1)
    k1, k2, k3, k4 = jax.random.split(key, 4)
    return dict(
        # conv1 weight (Cr, C, 1, 1) stored squeezed+transposed as (C, Cr)
        w1t=jax.random.normal(k1, (channel, cr), jnp.float32) / math.sqrt(channel),
        b1=0.01 * jax.random.normal(k2, (1, cr), jnp.float32),
        # conv2 weight (C, Cr, 1, 1) stored squeezed as (C, Cr)
        w2=jax.random.normal(k3, (channel, cr), jnp.float32) / math.sqrt(cr),
        b2=0.01 * jax.random.normal(k4, (1, channel), jnp.float32),
    )


if __name__ == "__main__":
    N, C, H, W = 2, 8, 16, 16
    reduction = 4

    key = jax.random.PRNGKey(0)
    kx, kp = jax.random.split(key)
    x = jax.random.normal(kx, (N, C, H, W), jnp.float32)            # NCHW input
    params = init_calayer_params(kp, C, reduction)

    ref = calayer_ref(x, params)

    # Fused single-pass path (the default / fast path).
    fused_fwd = jax.jit(calayer_forward)
    out = fused_fwd(x, params)
    jax.block_until_ready(out)
    assert out.shape == (N, C, H, W)
    assert jnp.allclose(out, ref, rtol=1e-4, atol=1e-4), "fused path mismatch"

    # Two-pass fallback path (exercised here for correctness coverage).
    two_pass_fwd = jax.jit(functools.partial(calayer_forward, force_two_pass=True))
    out2 = two_pass_fwd(x, params)
    jax.block_until_ready(out2)
    assert jnp.allclose(out2, ref, rtol=1e-4, atol=1e-4), "two-pass path mismatch"

    print("KERNEL_OK")
</pallas_src>

<mosaic_0001>
module attributes {stable_mosaic.version = 11 : i64} {
  func.func @_ca_fused_kernel(%arg0: i32, %arg1: memref<1x8x256xf32, #tpu.memory_space<vmem>>, %arg2: memref<8x2xf32, #tpu.memory_space<vmem>>, %arg3: memref<1x2xf32, #tpu.memory_space<vmem>>, %arg4: memref<8x2xf32, #tpu.memory_space<vmem>>, %arg5: memref<1x8xf32, #tpu.memory_space<vmem>>, %arg6: memref<1x8x256xf32, #tpu.memory_space<vmem>>) attributes {dimension_semantics = [#tpu.dimension_semantics<parallel>], iteration_bounds = array<i64: 2>, scalar_prefetch = 0 : i64, scratch_operands = 0 : i64, tpu.core_type = #tpu.core_type<tc>, window_params = [{transform_indices = @transform_0, window_bounds = array<i64: 1, 8, 256>}, {pipeline_mode = #tpu.pipeline_mode<synchronous>, transform_indices = @transform_1, window_bounds = array<i64: 8, 2>}, {pipeline_mode = #tpu.pipeline_mode<synchronous>, transform_indices = @transform_2, window_bounds = array<i64: 1, 2>}, {pipeline_mode = #tpu.pipeline_mode<synchronous>, transform_indices = @transform_3, window_bounds = array<i64: 8, 2>}, {pipeline_mode = #tpu.pipeline_mode<synchronous>, transform_indices = @transform_4, window_bounds = array<i64: 1, 8>}, {transform_indices = @transform_5, window_bounds = array<i64: 1, 8, 256>}]} {
    %c0 = arith.constant 0 : index
    %c0_0 = arith.constant 0 : index
    %c0_1 = arith.constant 0 : index
    %0 = vector.load %arg1[%c0, %c0_0, %c0_1] : memref<1x8x256xf32, #tpu.memory_space<vmem>>, vector<1x8x256xf32>
    %cst = arith.constant dense<0.000000e+00> : vector<1x8xf32>
    %1 = vector.multi_reduction <add>, %0, %cst [2] : vector<1x8x256xf32> to vector<1x8xf32>
    %cst_2 = arith.constant 3.906250e-03 : f32
    %2 = vector.broadcast %cst_2 : f32 to vector<1x8xf32>
    %3 = arith.mulf %1, %2 : vector<1x8xf32>
    %4 = vector.shape_cast %3 : vector<1x8xf32> to vector<1x8x1xf32>
    %c0_3 = arith.constant 0 : index
    %c0_4 = arith.constant 0 : index
    %5 = vector.load %arg2[%c0_3, %c0_4] : memref<8x2xf32, #tpu.memory_space<vmem>>, vector<8x2xf32>
    %6 = vector.shape_cast %5 : vector<8x2xf32> to vector<1x8x2xf32>
    %7 = vector.broadcast %4 : vector<1x8x1xf32> to vector<1x8x2xf32>
    %8 = arith.mulf %7, %6 : vector<1x8x2xf32>
    %cst_5 = arith.constant dense<0.000000e+00> : vector<1x2xf32>
    %9 = vector.multi_reduction <add>, %8, %cst_5 [1] : vector<1x8x2xf32> to vector<1x2xf32>
    %c0_6 = arith.constant 0 : index
    %c0_7 = arith.constant 0 : index
    %10 = vector.load %arg3[%c0_6, %c0_7] : memref<1x2xf32, #tpu.memory_space<vmem>>, vector<1x2xf32>
    %11 = arith.addf %9, %10 : vector<1x2xf32>
    %cst_8 = arith.constant 0.000000e+00 : f32
    %12 = vector.broadcast %cst_8 : f32 to vector<1x2xf32>
    %13 = arith.maximumf %11, %12 : vector<1x2xf32>
    %14 = vector.shape_cast %13 : vector<1x2xf32> to vector<1x1x2xf32>
    %c0_9 = arith.constant 0 : index
    %c0_10 = arith.constant 0 : index
    %15 = vector.load %arg4[%c0_9, %c0_10] : memref<8x2xf32, #tpu.memory_space<vmem>>, vector<8x2xf32>
    %16 = vector.shape_cast %15 : vector<8x2xf32> to vector<1x8x2xf32>
    %17 = vector.broadcast %14 : vector<1x1x2xf32> to vector<1x8x2xf32>
    %18 = arith.mulf %17, %16 : vector<1x8x2xf32>
    %cst_11 = arith.constant dense<0.000000e+00> : vector<1x8xf32>
    %19 = vector.multi_reduction <add>, %18, %cst_11 [2] : vector<1x8x2xf32> to vector<1x8xf32>
    %c0_12 = arith.constant 0 : index
    %c0_13 = arith.constant 0 : index
    %20 = vector.load %arg5[%c0_12, %c0_13] : memref<1x8xf32, #tpu.memory_space<vmem>>, vector<1x8xf32>
    %21 = arith.addf %19, %20 : vector<1x8xf32>
    %22 = arith.negf %21 : vector<1x8xf32>
    %23 = math.exp %22 : vector<1x8xf32>
    %cst_14 = arith.constant 1.000000e+00 : f32
    %24 = vector.broadcast %cst_14 : f32 to vector<1x8xf32>
    %25 = arith.addf %24, %23 : vector<1x8xf32>
    %26 = arith.divf %24, %25 : vector<1x8xf32>
    %c0_15 = arith.constant 0 : index
    %c0_16 = arith.constant 0 : index
    %c0_17 = arith.constant 0 : index
    %27 = vector.load %arg1[%c0_15, %c0_16, %c0_17] : memref<1x8x256xf32, #tpu.memory_space<vmem>>, vector<1x8x256xf32>
    %28 = vector.shape_cast %26 : vector<1x8xf32> to vector<1x8x1xf32>
    %29 = vector.broadcast %28 : vector<1x8x1xf32> to vector<1x8x256xf32>
    %30 = arith.mulf %27, %29 : vector<1x8x256xf32>
    %c0_18 = arith.constant 0 : index
    %c0_19 = arith.constant 0 : index
    %c0_20 = arith.constant 0 : index
    %31 = vector.load %arg6[%c0_18, %c0_19, %c0_20] : memref<1x8x256xf32, #tpu.memory_space<vmem>>, vector<1x8x256xf32>
    tpu.vector_store %arg6[%c0_18, %c0_19, %c0_20], %30 {strides = array<i32>} : memref<1x8x256xf32, #tpu.memory_space<vmem>>, vector<1x8x256xf32>,
    return
  }
  func.func @transform_0(%arg0: i32) -> (i32, i32, i32) {
    %c0_i32 = arith.constant 0 : i32
    %c0_i32_0 = arith.constant 0 : i32
    %c0_i32_1 = arith.constant 0 : i32
    return %arg0, %c0_i32, %c0_i32_0 : i32, i32, i32
  }
  func.func @transform_1(%arg0: i32) -> (i32, i32) {
    %c0_i32 = arith.constant 0 : i32
    %c0_i32_0 = arith.constant 0 : i32
    %c0_i32_1 = arith.constant 0 : i32
    return %c0_i32, %c0_i32_0 : i32, i32
  }
  func.func @transform_2(%arg0: i32) -> (i32, i32) {
    %c0_i32 = arith.constant 0 : i32
    %c0_i32_0 = arith.constant 0 : i32
    %c0_i32_1 = arith.constant 0 : i32
    return %c0_i32, %c0_i32_0 : i32, i32
  }
  func.func @transform_3(%arg0: i32) -> (i32, i32) {
    %c0_i32 = arith.constant 0 : i32
    %c0_i32_0 = arith.constant 0 : i32
    %c0_i32_1 = arith.constant 0 : i32
    return %c0_i32, %c0_i32_0 : i32, i32
  }
  func.func @transform_4(%arg0: i32) -> (i32, i32) {
    %c0_i32 = arith.constant 0 : i32
    %c0_i32_0 = arith.constant 0 : i32
    %c0_i32_1 = arith.constant 0 : i32
    return %c0_i32, %c0_i32_0 : i32, i32
  }
  func.func @transform_5(%arg0: i32) -> (i32, i32, i32) {
    %c0_i32 = arith.constant 0 : i32
    %c0_i32_0 = arith.constant 0 : i32
    %c0_i32_1 = arith.constant 0 : i32
    return %arg0, %c0_i32, %c0_i32_0 : i32, i32, i32
  }
}

</mosaic_0001>

<bundles_post_ra>
// kernel: calayer_forward.1
= control target key start
LH: loop header
LB: loop body
LE: loop exit
PB: predicated region body
PF: predicated region fallthrough
CT: control target
= control target key end

     0   :  { %s403_s18 = smov 0   ;;  %s441_s0 = inlined_call_operand.vmem [shape: f32[2,8,256], index: 0, kind: input, shape index: {}]   ;;  %s442_s1 = inlined_call_operand.vmem [shape: f32[8,2], index: 1, kind: input, shape index: {}]   ;;  %s443_s2 = inlined_call_operand.vmem [shape: f32[1,2], index: 2, kind: input, shape index: {}]   ;;  %s444_s3 = inlined_call_operand.vmem [shape: f32[8,2], index: 3, kind: input, shape index: {}]   ;;  %s445_s4 = inlined_call_operand.vmem [shape: f32[1,8], index: 4, kind: input, shape index: {}]   ;;  %s446_s5 = inlined_call_operand.vmem [shape: f32[2,8,256], index: 5, kind: output, shape index: {}]  }
   0x1 LB: > { %s334_s19 = sadd.s32 4294967295, %s370_s18   ;;  %p338_p0 = scmp.ge.s32.totalorder %s370_s18, 1  ;;  %s370_s18 = sphi %s403_s18, %s15_s18  }
   0x2   : > { %p187_p1 = scmp.lt.s32.totalorder %s370_s18, 3 }
   0x4   : > { %p188_p2 = pnand %p338_p0, %p187_p1 }
   0x5   : > { %p215_p3 = scmp.lt.s32.totalorder (!%p188_p2), %s334_s19, 1 }
   0x6   : > { %191 = sbr.rel (%p188_p2) target bundleno = 480 (0x1e0), region = 40 }
   0xb   : > { %s448_s19 = smov (!%p215_p3, %s334_s19), 1  ;;  %v343_v3 = vld [vmem:[%s445_s4] ss:$0 sm:$0xff]  ;;  %vm233_vm0 = vcmask 15360   ;;  %v245_v12 = vlaneseq  ;;  %v372_v25 = vmov 0  }
   0xc   : > { %s347_s20 = sshll.u32 %s448_s19, 4  ;;  %260 = vbcast.lane.b32.xlu1 %v343_v3, 256  ;;  %v231_v4 = vld [vmem:[%s442_s1] sm:$0xff]  ;;  %359 = vset.pattern.permute.xlu0 %v372_v25 }
   0xd   : > { %s219_s23 = scalar_lea.vmem %s441_s0, %s347_s20  ;;  %v246_v15 = vshrl.u32 %v245_v12, 7  ;;  %v241_v16 = vld [vmem:[%s443_s2] sm:$0x1]  ;;  %358 = vset.pattern.permute.xlu1 %v372_v25  ;;  %s224_s9 = scalar_lea.vmem %s446_s5, %s347_s20 }
   0xe   : > { %v225_v0 = vld [vmem:[%s219_s23] sm:$0xff]  ;;  %v226_v1 = vld [vmem:[%s219_s23 + $0x8] sm:$0xff] }
   0xf   : > { %v227_v2 = vadd.f32 %v226_v1, %v225_v0  ;;  %v247_v19 = vsub.s32 0, %v246_v15  ;;  %v244_v21 = vld [vmem:[%s444_s3] sm:$0xff] }
  0x11   : > { %228 = vadd.xlane.f32.xlu0 %v227_v2 }
  0x7e   : > { %v261_v26 = vpop.permute.xlu1 %260 }
  0x9a   : > { %v229_v5 = vpop.xlane.xlu0 %228 }
  0x9b   : > { %v230_v6 = vmul.f32 0.00390625, %v229_v5 }
  0x9d   : > { %v232_v7 = vmul.f32 %v231_v4, %v230_v6 }
  0x9f   : > { %v234_v8 = vsel %vm233_vm0, %v232_v7, 0.0 }
  0xa0   : > { %v235_v9 = vrot.slane %v234_v8, 4 }
  0xa2   : > { %v236_v10 = vadd.f32 %v235_v9, %v234_v8 }
  0xa4   : > { %v237_v11 = vrot.slane %v236_v10, 2 }
  0xa6   : > { %v238_v13 = vadd.f32 %v237_v11, %v236_v10 }
  0xa8   : > { %v239_v14 = vrot.slane %v238_v13, 1 }
  0xaa   : > { %v240_v17 = vadd.f32 %v239_v14, %v238_v13 }
  0xac   : > { %v242_v18 = vadd.f32 %v241_v16, %v240_v17 }
  0xae   : > { %v243_v20 = vmax.f32 %v242_v18, 0.0 }
  0xb0   : > { %v248_v22 = vrot.slane %v243_v20, %v247_v19 }
  0xb2   : > { %v249_v23 = vmul.f32 %v248_v22, %v244_v21 }
  0xb4   : > { %v250_v24 = vsel %vm233_vm0, %v249_v23, 0.0 }
  0xb5   : > { %251 = vadd.xlane.f32.xlu0 %v250_v24 }
 0x13e   : > { %v252_v27 = vpop.xlane.xlu0 %251 }
 0x13f   : > { %v263_v28 = vadd.f32 %v261_v26, %v252_v27 }
 0x141   : > { %v344_v29 = vmul.f32 -1.442695, %v263_v28 }
 0x143   : > { %360 = vpow2.f32 %v344_v29 }
 0x150   : > { %v361_v30 = vpop.eup %360 }
 0x151   : > { %v267_v31 = vadd.f32 1.0, %v361_v30 }
 0x153   : > { %362 = vrcp.f32 %v267_v31 }
 0x160   : > { %v363_v32 = vpop.eup %362 }
 0x161   : > { %272 = vperm.xlu1 %358, %v363_v32  }
 0x1dc   : > { %v273_v33 = vpop.permute.xlu1 %272 }
 0x1dd   : > { %v275_v34 = vmul.f32 %v273_v33, %v225_v0  ;;  %v276_v35 = vmul.f32 %v273_v33, %v226_v1 }
 0x1df   : > { %277 = vst [vmem:[%s224_s9] sm:$0xff] %v275_v34  ;;  %278 = vst [vmem:[%s224_s9 + $0x8] sm:$0xff] %v276_v35 }
 0x1e0 PF: > { %s15_s18 = sadd.s32 1, %s370_s18  }
 0x1e1   : > { %p12_p4 = scmp.ge.s32.totalorder %s15_s18, 4  }
 0x1e3   :  { %14 = sbr.rel (!%p12_p4) target bundleno = 1 (0x1), region = 70 }

</bundles_post_ra>
